<compile_context>
chip_gen: v7x
topology: tpu7x:2x2x1
jax: 0.10.0
libtpu: 0.0.40
codegen_flags: <defaults>
</compile_context>

<pallas_src>
import numpy as np
import jax
import jax.numpy as jnp
from jax.experimental import pallas as pl
from jax.experimental.pallas import tpu as pltpu


def _round_up(n, m):
    return ((n + m - 1) // m) * m


def linear_cls_kernel(x_ref, w_ref, o_ref):
    # x_ref: (TM, C_in) tile of point features (input dtype, f32 here)
    # w_ref: (C_in, P) prototype weights, VMEM-resident across all grid steps
    # o_ref: (TM, P) logits tile (bf16); MXU accumulates in f32
    o_ref[...] = jnp.dot(
        x_ref[...], w_ref[...], preferred_element_type=jnp.float32
    ).astype(o_ref.dtype)


def linear_cls_forward(x, w, *, tile_m=2048, out_dtype=jnp.bfloat16):
    """logits = x @ w  (kernel_size=1 Minkowski conv, no bias)."""
    N, c_in = x.shape
    c_in_w, P = w.shape
    assert c_in == c_in_w

    # Large tiles amortize per-step overhead, but cap so the grid has >= 2 steps
    # (both v7x TensorCores get work when the axis is marked "parallel").
    tm = max(8, min(tile_m, _round_up(pl.cdiv(N, 2), 8)))
    grid = (pl.cdiv(N, tm),)

    cost = pl.CostEstimate(
        flops=2 * N * c_in * P,
        transcendentals=0,
        bytes_accessed=(N * c_in * x.dtype.itemsize
                        + c_in * P * w.dtype.itemsize
                        + N * P * jnp.dtype(out_dtype).itemsize),
    )

    return pl.pallas_call(
        linear_cls_kernel,
        out_shape=jax.ShapeDtypeStruct((N, P), out_dtype),
        grid_spec=pltpu.PrefetchScalarGridSpec(
            num_scalar_prefetch=0,
            grid=grid,
            in_specs=[
                # (tm, c_in): last dim equals the full array dim -> legal block.
                pl.BlockSpec((tm, c_in), lambda i: (i, 0)),
                # Full weight, constant block index -> stays resident in VMEM.
                pl.BlockSpec((c_in, P), lambda i: (0, 0)),
            ],
            # Narrow (tm, P) output block: P equals the full array dim -> legal.
            out_specs=pl.BlockSpec((tm, P), lambda i: (i, 0)),
        ),
        compiler_params=pltpu.CompilerParams(
            dimension_semantics=("parallel",)),
        cost_estimate=cost,
    )(x, w)


def make_linear_cls_params(key, output_dim, num_prototypes):
    """MinkowskiConvolution(kernel_size=1, bias=False) weight: (output_dim, num_prototypes)."""
    return jax.random.normal(key, (output_dim, num_prototypes), jnp.float32) * 0.1


def linear_cls_reference(x, w):
    # Full-precision reference; the kernel matmul accumulates in f32 and only the
    # final logits are rounded to bf16 (precision change documented vs f32 PyTorch).
    return x @ w


if __name__ == "__main__":
    # TODO(synk): MinkowskiEngine coordinate-manager / sparse-tensor bookkeeping has no
    # Pallas equivalent; the kernel operates on the dense (N, C) feature matrix .F.
    output_dim = 32        # in-channels of the 1x1 conv head
    num_prototypes = 8     # out-channels (prototype logits)
    N = 1000               # number of active points (non-multiple of tile; partial block)

    key = jax.random.PRNGKey(0)
    k_x, k_w = jax.random.split(key)

    x = jax.random.normal(k_x, (N, output_dim), jnp.float32)      # sparse features (N, C)
    w = make_linear_cls_params(k_w, output_dim, num_prototypes)   # (C, P)

    logits = linear_cls_forward(x, w)
    logits = jax.block_until_ready(logits)

    ref = linear_cls_reference(x, w)
    np.testing.assert_allclose(np.asarray(logits, dtype=np.float32),
                               np.asarray(ref), rtol=2e-2, atol=2e-2)
    assert logits.shape == (N, num_prototypes)
    assert logits.dtype == jnp.bfloat16
    print("KERNEL_OK")
</pallas_src>

<mosaic_0001>
module attributes {stable_mosaic.version = 11 : i64} {
  func.func @linear_cls_kernel(%arg0: i32, %arg1: memref<504x32xf32, #tpu.memory_space<vmem>>, %arg2: memref<32x8xf32, #tpu.memory_space<vmem>>, %arg3: memref<504x8xbf16, #tpu.memory_space<vmem>>) attributes {dimension_semantics = [#tpu.dimension_semantics<parallel>], iteration_bounds = array<i64: 2>, scalar_prefetch = 0 : i64, scratch_operands = 0 : i64, tpu.core_type = #tpu.core_type<tc>, window_params = [{transform_indices = @transform_0, window_bounds = array<i64: 504, 32>}, {pipeline_mode = #tpu.pipeline_mode<synchronous>, transform_indices = @transform_1, window_bounds = array<i64: 32, 8>}, {transform_indices = @transform_2, window_bounds = array<i64: 504, 8>}]} {
    %c0 = arith.constant 0 : index
    %c0_0 = arith.constant 0 : index
    %0 = vector.load %arg1[%c0, %c0_0] : memref<504x32xf32, #tpu.memory_space<vmem>>, vector<504x32xf32>
    %c0_1 = arith.constant 0 : index
    %c0_2 = arith.constant 0 : index
    %1 = vector.load %arg2[%c0_1, %c0_2] : memref<32x8xf32, #tpu.memory_space<vmem>>, vector<32x8xf32>
    %cst = arith.constant dense<0.000000e+00> : vector<504x8xf32>
    %2 = tpu.matmul %0, %1, %cst {dimension_numbers = #tpu.dot_dimension_numbers<[1], [0], [0], [1], [0, 0, 1, 1], [], []>} : vector<504x32xf32>, vector<32x8xf32>, vector<504x8xf32> -> vector<504x8xf32>
    %3 = arith.truncf %2 : vector<504x8xf32> to vector<504x8xbf16>
    %c0_3 = arith.constant 0 : index
    %c0_4 = arith.constant 0 : index
    %4 = vector.load %arg3[%c0_3, %c0_4] : memref<504x8xbf16, #tpu.memory_space<vmem>>, vector<504x8xbf16>
    tpu.vector_store %arg3[%c0_3, %c0_4], %3 {strides = array<i32>} : memref<504x8xbf16, #tpu.memory_space<vmem>>, vector<504x8xbf16>,
    return
  }
  func.func @transform_0(%arg0: i32) -> (i32, i32) {
    %c0_i32 = arith.constant 0 : i32
    %c0_i32_0 = arith.constant 0 : i32
    return %arg0, %c0_i32 : i32, i32
  }
  func.func @transform_1(%arg0: i32) -> (i32, i32) {
    %c0_i32 = arith.constant 0 : i32
    %c0_i32_0 = arith.constant 0 : i32
    %c0_i32_1 = arith.constant 0 : i32
    return %c0_i32, %c0_i32_0 : i32, i32
  }
  func.func @transform_2(%arg0: i32) -> (i32, i32) {
    %c0_i32 = arith.constant 0 : i32
    %c0_i32_0 = arith.constant 0 : i32
    return %arg0, %c0_i32 : i32, i32
  }
}

</mosaic_0001>

<bundles_post_ra>
// kernel: tpu_custom_call.1
= control target key start
LH: loop header
LB: loop body
LE: loop exit
PB: predicated region body
PF: predicated region fallthrough
CT: control target
= control target key end

     0   :  { %s2267_s9 = smov 0   ;;  %s2269_s10 = smov 0   ;;  %s2891_s0 = inlined_call_operand.vmem [shape: f32[1000,32], index: 0, kind: input, shape index: {}]   ;;  %s2892_s1 = inlined_call_operand.vmem [shape: f32[32,8], index: 1, kind: input, shape index: {}]   ;;  %s2893_s2 = inlined_call_operand.vmem [shape: bf16[1000,8], index: 2, kind: output, shape index: {}]  }
   0x1   :  { %s2271_s11 = smov 0  }
   0x2 LB: > { %s2280_s12 = sadd.s32 4294967295, %s2215_s11   ;;  %s2282_s13 = sadd.s32 1, %s2215_s11   ;;  %s2215_s11 = sphi %s2271_s11, %s2900_s11   ;;  %s2211_s10 = sphi %s2269_s10, %s2899_s10   ;;  %s2207_s9 = sphi %s2267_s9, %s2898_s9  }
   0x3   : > { %s63_s14 = ssub.s32 %s2215_s11, %s2282_s13  ;;  %s66_s15 = sadd.s32 1, %s2211_s10 }
   0x4   : > { %p64_p0 = scmp.eq.s32.totalorder %s63_s14, 0  ;;  %p76_p1 = scmp.ne.s32.totalorder %s2211_s10, %s2207_s9 }
   0x5   : > { %p77_p2 = scmp.eq.s32.totalorder %s2280_s12, 1  ;;  %p1586_p3 = scmp.ge.s32.totalorder %s2215_s11, 1 }
   0x6   : > { %s2290_s16 = scalar_select %p64_p0, %s2211_s10, %s66_s15  }
   0x7   : > { %p2292_p4 = por %p77_p2, %p76_p1  ;;  %p121_p5 = scmp.lt.s32.totalorder %s2215_s11, 3 }
   0x9   : > { %p122_p6 = pnand %p1586_p3, %p121_p5 }
   0xa   : > { %v228_v0 = vld [vmem:[%s2892_s1] sm:$0xff] (!%p122_p6)  ;;  %v229_v1 = vld [vmem:[%s2892_s1 + $0x8] sm:$0xff] (!%p122_p6)  ;;  %v230_v2 = vld [vmem:[%s2892_s1 + $0x10] sm:$0xff] (!%p122_p6)  ;;  %v2249_v3 = vmov (!%p122_p6), 0.0|0.0   ;;  %s2309_s26 = smul.u32 (!%p122_p6), 63, %s2280_s12  ;;  %vm2250_vm0 = vmmov (!%p122_p6), 0  }
   0xb   : > { %125 = sbr.rel (%p122_p6) target bundleno = 465 (0x1d1), region = 28  ;;  %2054 = vmatprep.subr.bf16.mxu0 (!%p122_p6), %v2249_v3  ;;  %v2055_v4 = vpack.c.bf16 (!%p122_p6), %v229_v1, %v228_v0  ;;  %2060 = vmatprep.subr.bf16.mxu1 (!%p122_p6), %v2249_v3  ;;  %v231_v5 = vld [vmem:[%s2892_s1 + $0x18] sm:$0xff] (!%p122_p6)  ;;  %v2251_v6 = vmov (!%p122_p6), 0.0   ;;  %vm232_vm1 = vcmask (!%p122_p6), 261120   ;;  %s143_s4 = sand.u32 (!%p122_p6), 1, %s2207_s9   ;;  %vm1055_vm2 = vcmask (!%p122_p6), 60416  }
   0xc   : > { %1865 = vmatprep.mubr.msk.f32.mxu0 (!%p122_p6), %vm2250_vm0, %v2251_v6  ;;  %1961 = vmatprep.mubr.msk.f32.mxu1 (!%p122_p6), %vm2250_vm0, %v2251_v6  ;;  %v2058_v7 = vpack.c.bf16 (!%p122_p6), %v231_v5, %v230_v2  ;;  %p151_p7 = scmp.lt.s32.totalorder (!%p122_p6), %s2309_s26, 124  ;;  %s2064_s5 = smul.u32 (!%p122_p6), 252, %s143_s4 }
   0xd   : > { %2056 = vmatpush3.bf16.msra.mxu0 (!%p122_p6), %v2055_v4  ;;  %2062 = vmatpush3.bf16.msra.mxu1 (!%p122_p6), %v2055_v4 }
   0xe   : > { %2057 = vmatprep.subr.bf16.mxu0 (!%p122_p6), %v2249_v3  ;;  %2061 = vmatprep.subr.bf16.mxu1 (!%p122_p6), %v2249_v3  ;;  %s2571_s6 = scalar_lea.vmem (!%p122_p6), [#allocation2], %s2064_s5  }
  0x11   : > { %2059 = vmatpush3.bf16.msra.mxu0 (!%p122_p6), %v2058_v7  ;;  %2063 = vmatpush3.bf16.msra.mxu1 (!%p122_p6), %v2058_v7 }
  0x12   : > { %s152_s27 = scalar_select %p151_p7, %s2309_s26, 124 }
  0x13   : > { %s1127_s7 = ssub.s32 (%p2292_p4), 125, %s2309_s26  ;;  %s1789_s8 = smul.u32 (%p2292_p4), 252, %s2280_s12 }
  0x14   : > { %s1587_s28 = sshll.u32 %s152_s27, 3  ;;  %p1128_p8 = scmp.lt.s32.totalorder (%p2292_p4), %s1127_s7, 63 }
  0x15   : > { %s2320_s3 = scalar_lea.vmem %s2891_s0, %s1587_s28  ;;  %s2706_s14 = scalar_lea.vmem (%p2292_p4), %s2893_s2, %s1789_s8  }
  0x16   : > { %v165_v8 = vld [vmem:[%s2320_s3] sm:$0xff]  ;;  %v166_v10 = vld [vmem:[%s2320_s3 + $0x8] sm:$0xff]  ;;  %v167_v12 = vld [vmem:[%s2320_s3 + $0x10] sm:$0xff] }
  0x17   : > { %v197_v9 = vld [vmem:[%s2320_s3 + $0x100] sm:$0xff]  ;;  %1866 = vmatmul.mubr.msk.f32.vlgmr.msra.gmra.mrb[0].mxu0 %vm232_vm1, %v165_v8  ;;  %v198_v11 = vld [vmem:[%s2320_s3 + $0x108] sm:$0xff]  ;;  %v199_v13 = vld [vmem:[%s2320_s3 + $0x110] sm:$0xff] }
  0x18   : > { %1962 = vmatmul.mubr.msk.f32.vlgmr.msra.gmra.mrb[0].mxu1 %vm232_vm1, %v197_v9  ;;  %1868 = vmatprep.mubr.msk.f32.mxu0 %vm2250_vm0, %v2251_v6  ;;  %v168_v14 = vld [vmem:[%s2320_s3 + $0x18] sm:$0xff]  ;;  %v169_v16 = vld [vmem:[%s2320_s3 + $0x20] sm:$0xff]  ;;  %v170_v18 = vld [vmem:[%s2320_s3 + $0x28] sm:$0xff] }
  0x19   : > { %1964 = vmatprep.mubr.msk.f32.mxu1 %vm2250_vm0, %v2251_v6  ;;  %v200_v15 = vld [vmem:[%s2320_s3 + $0x118] sm:$0xff]  ;;  %v201_v17 = vld [vmem:[%s2320_s3 + $0x120] sm:$0xff]  ;;  %v202_v19 = vld [vmem:[%s2320_s3 + $0x128] sm:$0xff] }
  0x1a   : > { %v171_v20 = vld [vmem:[%s2320_s3 + $0x30] sm:$0xff]  ;;  %v172_v22 = vld [vmem:[%s2320_s3 + $0x38] sm:$0xff]  ;;  %v173_v24 = vld [vmem:[%s2320_s3 + $0x40] sm:$0xff] }
  0x1b   : > { %1869 = vmatmul.mubr.msk.f32.gmra.mrb[2].mxu0 %vm232_vm1, %v166_v10  ;;  %v203_v21 = vld [vmem:[%s2320_s3 + $0x130] sm:$0xff]  ;;  %v204_v23 = vld [vmem:[%s2320_s3 + $0x138] sm:$0xff]  ;;  %v205_v25 = vld [vmem:[%s2320_s3 + $0x140] sm:$0xff] }
  0x1c   : > { %1965 = vmatmul.mubr.msk.f32.gmra.mrb[2].mxu1 %vm232_vm1, %v198_v11  ;;  %1871 = vmatprep.mubr.msk.f32.mxu0 %vm2250_vm0, %v2251_v6  ;;  %v174_v26 = vld [vmem:[%s2320_s3 + $0x48] sm:$0xff]  ;;  %v175_v28 = vld [vmem:[%s2320_s3 + $0x50] sm:$0xff]  ;;  %v176_v30 = vld [vmem:[%s2320_s3 + $0x58] sm:$0xff] }
  0x1d   : > { %1967 = vmatprep.mubr.msk.f32.mxu1 %vm2250_vm0, %v2251_v6  ;;  %v206_v27 = vld [vmem:[%s2320_s3 + $0x148] sm:$0xff]  ;;  %v207_v29 = vld [vmem:[%s2320_s3 + $0x150] sm:$0xff]  ;;  %v208_v31 = vld [vmem:[%s2320_s3 + $0x158] sm:$0xff] }
  0x1e   : > { %v177_v32 = vld [vmem:[%s2320_s3 + $0x60] sm:$0xff]  ;;  %v178_v34 = vld [vmem:[%s2320_s3 + $0x68] sm:$0xff]  ;;  %v179_v36 = vld [vmem:[%s2320_s3 + $0x70] sm:$0xff] }
  0x1f   : > { %1872 = vmatmul.mubr.msk.f32.gmra.mrb[4].mxu0 %vm232_vm1, %v167_v12  ;;  %v209_v33 = vld [vmem:[%s2320_s3 + $0x160] sm:$0xff]  ;;  %v210_v35 = vld [vmem:[%s2320_s3 + $0x168] sm:$0xff]  ;;  %v211_v37 = vld [vmem:[%s2320_s3 + $0x170] sm:$0xff] }
  0x20   : > { %1968 = vmatmul.mubr.msk.f32.gmra.mrb[4].mxu1 %vm232_vm1, %v199_v13  ;;  %1874 = vmatprep.mubr.msk.f32.mxu0 %vm2250_vm0, %v2251_v6  ;;  %v180_v38 = vld [vmem:[%s2320_s3 + $0x78] sm:$0xff]  ;;  %v181_v40 = vld [vmem:[%s2320_s3 + $0x80] sm:$0xff]  ;;  %v182_v42 = vld [vmem:[%s2320_s3 + $0x88] sm:$0xff] }
  0x21   : > { %1970 = vmatprep.mubr.msk.f32.mxu1 %vm2250_vm0, %v2251_v6  ;;  %v212_v39 = vld [vmem:[%s2320_s3 + $0x178] sm:$0xff]  ;;  %v213_v41 = vld [vmem:[%s2320_s3 + $0x180] sm:$0xff]  ;;  %v214_v43 = vld [vmem:[%s2320_s3 + $0x188] sm:$0xff] }
  0x22   : > { %v183_v44 = vld [vmem:[%s2320_s3 + $0x90] sm:$0xff]  ;;  %v184_v46 = vld [vmem:[%s2320_s3 + $0x98] sm:$0xff]  ;;  %v185_v48 = vld [vmem:[%s2320_s3 + $0xa0] sm:$0xff] }
  0x23   : > { %1875 = vmatmul.mubr.msk.f32.gmra.mrb[6].mxu0 %vm232_vm1, %v168_v14  ;;  %v215_v45 = vld [vmem:[%s2320_s3 + $0x190] sm:$0xff]  ;;  %v216_v47 = vld [vmem:[%s2320_s3 + $0x198] sm:$0xff]  ;;  %v217_v49 = vld [vmem:[%s2320_s3 + $0x1a0] sm:$0xff] }
  0x24   : > { %1971 = vmatmul.mubr.msk.f32.gmra.mrb[6].mxu1 %vm232_vm1, %v200_v15  ;;  %1877 = vmatprep.mubr.msk.f32.mxu0 %vm2250_vm0, %v2251_v6  ;;  %v186_v50 = vld [vmem:[%s2320_s3 + $0xa8] sm:$0xff]  ;;  %v187_v52 = vld [vmem:[%s2320_s3 + $0xb0] sm:$0xff]  ;;  %v188_v54 = vld [vmem:[%s2320_s3 + $0xb8] sm:$0xff] }
  0x25   : > { %1973 = vmatprep.mubr.msk.f32.mxu1 %vm2250_vm0, %v2251_v6  ;;  %v218_v51 = vld [vmem:[%s2320_s3 + $0x1a8] sm:$0xff]  ;;  %v219_v53 = vld [vmem:[%s2320_s3 + $0x1b0] sm:$0xff]  ;;  %v220_v55 = vld [vmem:[%s2320_s3 + $0x1b8] sm:$0xff] }
  0x26   : > { %v189_v56 = vld [vmem:[%s2320_s3 + $0xc0] sm:$0xff]  ;;  %v190_v58 = vld [vmem:[%s2320_s3 + $0xc8] sm:$0xff]  ;;  %v191_v60 = vld [vmem:[%s2320_s3 + $0xd0] sm:$0xff] }
  0x27   : > { %1878 = vmatmul.mubr.msk.f32.gmra.mrb[8].mxu0 %vm232_vm1, %v169_v16  ;;  %v221_v57 = vld [vmem:[%s2320_s3 + $0x1c0] sm:$0xff]  ;;  %v222_v59 = vld [vmem:[%s2320_s3 + $0x1c8] sm:$0xff]  ;;  %v223_v61 = vld [vmem:[%s2320_s3 + $0x1d0] sm:$0xff] }
  0x28   : > { %1974 = vmatmul.mubr.msk.f32.gmra.mrb[8].mxu1 %vm232_vm1, %v201_v17  ;;  %1880 = vmatprep.mubr.msk.f32.mxu0 %vm2250_vm0, %v2251_v6  ;;  %v192_v62 = vld [vmem:[%s2320_s3 + $0xd8] sm:$0xff]  ;;  %v193_v0 = vld [vmem:[%s2320_s3 + $0xe0] sm:$0xff]  ;;  %v194_v2 = vld [vmem:[%s2320_s3 + $0xe8] sm:$0xff] }
  0x29   : > { %1976 = vmatprep.mubr.msk.f32.mxu1 %vm2250_vm0, %v2251_v6  ;;  %v224_v63 = vld [vmem:[%s2320_s3 + $0x1d8] sm:$0xff]  ;;  %v225_v1 = vld [vmem:[%s2320_s3 + $0x1e0] sm:$0xff]  ;;  %v226_v3 = vld [vmem:[%s2320_s3 + $0x1e8] sm:$0xff] }
  0x2a   : > { %v195_v4 = vld [vmem:[%s2320_s3 + $0xf0] sm:$0xff]  ;;  %v196_v7 = vld [vmem:[%s2320_s3 + $0xf8] sm:$0xff] }
  0x2b   : > { %1881 = vmatmul.mubr.msk.f32.gmra.mrb[10].mxu0 %vm232_vm1, %v170_v18  ;;  %v227_v5 = vld [vmem:[%s2320_s3 + $0x1f0] sm:$0xff] }
  0x2c   : > { %1977 = vmatmul.mubr.msk.f32.gmra.mrb[10].mxu1 %vm232_vm1, %v202_v19  ;;  %1883 = vmatprep.mubr.msk.f32.mxu0 %vm2250_vm0, %v2251_v6 }
  0x2d   : > { %1979 = vmatprep.mubr.msk.f32.mxu1 %vm2250_vm0, %v2251_v6 }
  0x2f   : > { %1884 = vmatmul.mubr.msk.f32.gmra.mrb[12].mxu0 %vm232_vm1, %v171_v20 }
  0x30   : > { %1980 = vmatmul.mubr.msk.f32.gmra.mrb[12].mxu1 %vm232_vm1, %v203_v21  ;;  %1886 = vmatprep.mubr.msk.f32.mxu0 %vm2250_vm0, %v2251_v6 }
  0x31   : > { %1982 = vmatprep.mubr.msk.f32.mxu1 %vm2250_vm0, %v2251_v6 }
  0x33   : > { %1887 = vmatmul.mubr.msk.f32.gmra.mrb[14].mxu0 %vm232_vm1, %v172_v22 }
  0x34   : > { %1983 = vmatmul.mubr.msk.f32.gmra.mrb[14].mxu1 %vm232_vm1, %v204_v23  ;;  %1889 = vmatprep.mubr.msk.f32.mxu0 %vm2250_vm0, %v2251_v6 }
  0x35   : > { %1985 = vmatprep.mubr.msk.f32.mxu1 %vm2250_vm0, %v2251_v6 }
  0x37   : > { %1890 = vmatmul.mubr.msk.f32.gmra.mrb[16].mxu0 %vm232_vm1, %v173_v24 }
  0x38   : > { %1986 = vmatmul.mubr.msk.f32.gmra.mrb[16].mxu1 %vm232_vm1, %v205_v25  ;;  %1892 = vmatprep.mubr.msk.f32.mxu0 %vm2250_vm0, %v2251_v6 }
  0x39   : > { %1988 = vmatprep.mubr.msk.f32.mxu1 %vm2250_vm0, %v2251_v6 }
  0x3b   : > { %1893 = vmatmul.mubr.msk.f32.gmra.mrb[18].mxu0 %vm232_vm1, %v174_v26 }
  0x3c   : > { %1989 = vmatmul.mubr.msk.f32.gmra.mrb[18].mxu1 %vm232_vm1, %v206_v27  ;;  %1895 = vmatprep.mubr.msk.f32.mxu0 %vm2250_vm0, %v2251_v6 }
  0x3d   : > { %1991 = vmatprep.mubr.msk.f32.mxu1 %vm2250_vm0, %v2251_v6 }
  0x3f   : > { %1896 = vmatmul.mubr.msk.f32.gmra.mrb[20].mxu0 %vm232_vm1, %v175_v28 }
  0x40   : > { %1992 = vmatmul.mubr.msk.f32.gmra.mrb[20].mxu1 %vm232_vm1, %v207_v29  ;;  %1898 = vmatprep.mubr.msk.f32.mxu0 %vm2250_vm0, %v2251_v6 }
  0x41   : > { %1994 = vmatprep.mubr.msk.f32.mxu1 %vm2250_vm0, %v2251_v6 }
  0x43   : > { %1899 = vmatmul.mubr.msk.f32.gmra.mrb[22].mxu0 %vm232_vm1, %v176_v30 }
  0x44   : > { %1995 = vmatmul.mubr.msk.f32.gmra.mrb[22].mxu1 %vm232_vm1, %v208_v31  ;;  %1901 = vmatprep.mubr.msk.f32.mxu0 %vm2250_vm0, %v2251_v6 }
  0x45   : > { %1997 = vmatprep.mubr.msk.f32.mxu1 %vm2250_vm0, %v2251_v6 }
  0x47   : > { %1902 = vmatmul.mubr.msk.f32.gmra.mrb[24].mxu0 %vm232_vm1, %v177_v32 }
  0x48   : > { %1998 = vmatmul.mubr.msk.f32.gmra.mrb[24].mxu1 %vm232_vm1, %v209_v33  ;;  %1904 = vmatprep.mubr.msk.f32.mxu0 %vm2250_vm0, %v2251_v6 }
  0x49   : > { %2000 = vmatprep.mubr.msk.f32.mxu1 %vm2250_vm0, %v2251_v6 }
  0x4b   : > { %1905 = vmatmul.mubr.msk.f32.gmra.mrb[26].mxu0 %vm232_vm1, %v178_v34 }
  0x4c   : > { %2001 = vmatmul.mubr.msk.f32.gmra.mrb[26].mxu1 %vm232_vm1, %v210_v35  ;;  %1907 = vmatprep.mubr.msk.f32.mxu0 %vm2250_vm0, %v2251_v6 }
  0x4d   : > { %2003 = vmatprep.mubr.msk.f32.mxu1 %vm2250_vm0, %v2251_v6 }
  0x4f   : > { %1908 = vmatmul.mubr.msk.f32.gmra.mrb[28].mxu0 %vm232_vm1, %v179_v36 }
  0x50   : > { %2004 = vmatmul.mubr.msk.f32.gmra.mrb[28].mxu1 %vm232_vm1, %v211_v37  ;;  %1910 = vmatprep.mubr.msk.f32.mxu0 %vm2250_vm0, %v2251_v6 }
  0x51   : > { %2006 = vmatprep.mubr.msk.f32.mxu1 %vm2250_vm0, %v2251_v6 }
  0x53   : > { %1911 = vmatmul.mubr.msk.f32.gmra.mrb[30].mxu0 %vm232_vm1, %v180_v38 }
  0x54   : > { %2007 = vmatmul.mubr.msk.f32.gmra.mrb[30].mxu1 %vm232_vm1, %v212_v39  ;;  %1913 = vmatprep.mubr.msk.f32.mxu0 %vm2250_vm0, %v2251_v6 }
  0x55   : > { %2009 = vmatprep.mubr.msk.f32.mxu1 %vm2250_vm0, %v2251_v6 }
  0x57   : > { %1914 = vmatmul.mubr.msk.f32.gmra.mrb[32].mxu0 %vm232_vm1, %v181_v40 }
  0x58   : > { %2010 = vmatmul.mubr.msk.f32.gmra.mrb[32].mxu1 %vm232_vm1, %v213_v41  ;;  %1916 = vmatprep.mubr.msk.f32.mxu0 %vm2250_vm0, %v2251_v6 }
  0x59   : > { %2012 = vmatprep.mubr.msk.f32.mxu1 %vm2250_vm0, %v2251_v6 }
  0x5b   : > { %1917 = vmatmul.mubr.msk.f32.gmra.mrb[34].mxu0 %vm232_vm1, %v182_v42 }
  0x5c   : > { %2013 = vmatmul.mubr.msk.f32.gmra.mrb[34].mxu1 %vm232_vm1, %v214_v43  ;;  %1919 = vmatprep.mubr.msk.f32.mxu0 %vm2250_vm0, %v2251_v6 }
  0x5d   : > { %2015 = vmatprep.mubr.msk.f32.mxu1 %vm2250_vm0, %v2251_v6 }
  0x5f   : > { %1920 = vmatmul.mubr.msk.f32.gmra.mrb[36].mxu0 %vm232_vm1, %v183_v44 }
  0x60   : > { %2016 = vmatmul.mubr.msk.f32.gmra.mrb[36].mxu1 %vm232_vm1, %v215_v45  ;;  %1922 = vmatprep.mubr.msk.f32.mxu0 %vm2250_vm0, %v2251_v6 }
  0x61   : > { %2018 = vmatprep.mubr.msk.f32.mxu1 %vm2250_vm0, %v2251_v6 }
  0x63   : > { %1923 = vmatmul.mubr.msk.f32.gmra.mrb[38].mxu0 %vm232_vm1, %v184_v46 }
  0x64   : > { %2019 = vmatmul.mubr.msk.f32.gmra.mrb[38].mxu1 %vm232_vm1, %v216_v47  ;;  %1925 = vmatprep.mubr.msk.f32.mxu0 %vm2250_vm0, %v2251_v6 }
  0x65   : > { %2021 = vmatprep.mubr.msk.f32.mxu1 %vm2250_vm0, %v2251_v6 }
  0x67   : > { %1926 = vmatmul.mubr.msk.f32.gmra.mrb[40].mxu0 %vm232_vm1, %v185_v48 }
  0x68   : > { %2022 = vmatmul.mubr.msk.f32.gmra.mrb[40].mxu1 %vm232_vm1, %v217_v49  ;;  %1928 = vmatprep.mubr.msk.f32.mxu0 %vm2250_vm0, %v2251_v6 }
  0x69   : > { %2024 = vmatprep.mubr.msk.f32.mxu1 %vm2250_vm0, %v2251_v6 }
  0x6b   : > { %1929 = vmatmul.mubr.msk.f32.gmra.mrb[42].mxu0 %vm232_vm1, %v186_v50 }
  0x6c   : > { %2025 = vmatmul.mubr.msk.f32.gmra.mrb[42].mxu1 %vm232_vm1, %v218_v51  ;;  %1931 = vmatprep.mubr.msk.f32.mxu0 %vm2250_vm0, %v2251_v6 }
  0x6d   : > { %2027 = vmatprep.mubr.msk.f32.mxu1 %vm2250_vm0, %v2251_v6 }
  0x6f   : > { %1932 = vmatmul.mubr.msk.f32.gmra.mrb[44].mxu0 %vm232_vm1, %v187_v52 }
  0x70   : > { %2028 = vmatmul.mubr.msk.f32.gmra.mrb[44].mxu1 %vm232_vm1, %v219_v53  ;;  %1934 = vmatprep.mubr.msk.f32.mxu0 %vm2250_vm0, %v2251_v6 }
  0x71   : > { %2030 = vmatprep.mubr.msk.f32.mxu1 %vm2250_vm0, %v2251_v6 }
  0x73   : > { %1935 = vmatmul.mubr.msk.f32.gmra.mrb[46].mxu0 %vm232_vm1, %v188_v54 }
  0x74   : > { %2031 = vmatmul.mubr.msk.f32.gmra.mrb[46].mxu1 %vm232_vm1, %v220_v55  ;;  %1937 = vmatprep.mubr.msk.f32.mxu0 %vm2250_vm0, %v2251_v6 }
  0x75   : > { %2033 = vmatprep.mubr.msk.f32.mxu1 %vm2250_vm0, %v2251_v6 }
  0x77   : > { %1938 = vmatmul.mubr.msk.f32.gmra.mrb[48].mxu0 %vm232_vm1, %v189_v56 }
  0x78   : > { %2034 = vmatmul.mubr.msk.f32.gmra.mrb[48].mxu1 %vm232_vm1, %v221_v57  ;;  %1940 = vmatprep.mubr.msk.f32.mxu0 %vm2250_vm0, %v2251_v6 }
  0x79   : > { %2036 = vmatprep.mubr.msk.f32.mxu1 %vm2250_vm0, %v2251_v6 }
  0x7b   : > { %1941 = vmatmul.mubr.msk.f32.gmra.mrb[50].mxu0 %vm232_vm1, %v190_v58 }
  0x7c   : > { %2037 = vmatmul.mubr.msk.f32.gmra.mrb[50].mxu1 %vm232_vm1, %v222_v59  ;;  %1943 = vmatprep.mubr.msk.f32.mxu0 %vm2250_vm0, %v2251_v6 }
  0x7d   : > { %2039 = vmatprep.mubr.msk.f32.mxu1 %vm2250_vm0, %v2251_v6 }
  0x7f   : > { %1944 = vmatmul.mubr.msk.f32.gmra.mrb[52].mxu0 %vm232_vm1, %v191_v60 }
  0x80   : > { %2040 = vmatmul.mubr.msk.f32.gmra.mrb[52].mxu1 %vm232_vm1, %v223_v61  ;;  %1946 = vmatprep.mubr.msk.f32.mxu0 %vm2250_vm0, %v2251_v6 }
  0x81   : > { %2042 = vmatprep.mubr.msk.f32.mxu1 %vm2250_vm0, %v2251_v6 }
  0x83   : > { %1947 = vmatmul.mubr.msk.f32.gmra.mrb[54].mxu0 %vm232_vm1, %v192_v62 }
  0x84   : > { %2043 = vmatmul.mubr.msk.f32.gmra.mrb[54].mxu1 %vm232_vm1, %v224_v63  ;;  %1949 = vmatprep.mubr.msk.f32.mxu0 %vm2250_vm0, %v2251_v6 }
  0x85   : > { %2045 = vmatprep.mubr.msk.f32.mxu1 %vm2250_vm0, %v2251_v6 }
  0x87   : > { %1950 = vmatmul.mubr.msk.f32.gmra.mrb[56].mxu0 %vm232_vm1, %v193_v0 }
  0x88   : > { %2046 = vmatmul.mubr.msk.f32.gmra.mrb[56].mxu1 %vm232_vm1, %v225_v1  ;;  %1952 = vmatprep.mubr.msk.f32.mxu0 %vm2250_vm0, %v2251_v6 }
  0x89   : > { %2048 = vmatprep.mubr.msk.f32.mxu1 %vm2250_vm0, %v2251_v6 }
  0x8b   : > { %1953 = vmatmul.mubr.msk.f32.gmra.mrb[58].mxu0 %vm232_vm1, %v194_v2 }
  0x8c   : > { %2049 = vmatmul.mubr.msk.f32.gmra.mrb[58].mxu1 %vm232_vm1, %v226_v3  ;;  %1955 = vmatprep.mubr.msk.f32.mxu0 %vm2250_vm0, %v2251_v6 }
  0x8d   : > { %2051 = vmatprep.mubr.msk.f32.mxu1 %vm2250_vm0, %v2251_v6 }
  0x8f   : > { %1956 = vmatmul.mubr.msk.f32.gmra.mrb[60].mxu0 %vm232_vm1, %v195_v4 }
  0x90   : > { %2052 = vmatmul.mubr.msk.f32.gmra.mrb[60].mxu1 %vm232_vm1, %v227_v5  ;;  %1958 = vmatprep.mubr.msk.f32.mxu0 %vm2250_vm0, %v2251_v6 }
  0x93   : > { %1959 = vmatmul.mubr.msk.f32.gmra.mrb[62].mxu0 %vm232_vm1, %v196_v7 }
  0xea   : > { %v488_v8 = vpop.f32.mrb[0].mxu0 }
  0xeb   : > { %v648_v9 = vpop.f32.mrb[0].mxu1  ;;  %v1726_v10 = vpack.c.bf16 %v488_v8, %v488_v8  ;;  %v1867_v11 = vpop.f32.mrb[1].mxu0 }
  0xec   : > { %v1758_v12 = vpack.c.bf16 %v648_v9, %v648_v9  ;;  %v1963_v13 = vpop.f32.mrb[1].mxu1 }
  0xed   : > { %1056 = vst.msk [vmem:[%s2571_s6] sm:$0xf] %vm1055_vm2, %v1726_v10 }
  0xee   : > { %1088 = vst.msk [vmem:[%s2571_s6 + $0x80] sm:$0xf] %vm1055_vm2, %v1758_v12  ;;  %v493_v6 = vpop.f32.mrb[2].mxu0 }
  0xef   : > { %v653_v14 = vpop.f32.mrb[2].mxu1  ;;  %v1727_v15 = vpack.c.bf16 %v493_v6, %v493_v6  ;;  %v1870_v16 = vpop.f32.mrb[3].mxu0 }
  0xf0   : > { %v1759_v17 = vpack.c.bf16 %v653_v14, %v653_v14  ;;  %v1966_v18 = vpop.f32.mrb[3].mxu1 }
  0xf1   : > { %1057 = vst.msk [vmem:[%s2571_s6 + $0x4] sm:$0xf] %vm1055_vm2, %v1727_v15 }
  0xf2   : > { %1089 = vst.msk [vmem:[%s2571_s6 + $0x84] sm:$0xf] %vm1055_vm2, %v1759_v17  ;;  %v498_v19 = vpop.f32.mrb[4].mxu0 }
  0xf3   : > { %v658_v20 = vpop.f32.mrb[4].mxu1  ;;  %v1728_v21 = vpack.c.bf16 %v498_v19, %v498_v19  ;;  %v1873_v22 = vpop.f32.mrb[5].mxu0 }
  0xf4   : > { %v1760_v23 = vpack.c.bf16 %v658_v20, %v658_v20  ;;  %v1969_v24 = vpop.f32.mrb[5].mxu1 }
  0xf5   : > { %1058 = vst.msk [vmem:[%s2571_s6 + $0x8] sm:$0xf] %vm1055_vm2, %v1728_v21 }
  0xf6   : > { %1090 = vst.msk [vmem:[%s2571_s6 + $0x88] sm:$0xf] %vm1055_vm2, %v1760_v23  ;;  %v503_v25 = vpop.f32.mrb[6].mxu0 }
  0xf7   : > { %v663_v26 = vpop.f32.mrb[6].mxu1  ;;  %v1729_v27 = vpack.c.bf16 %v503_v25, %v503_v25  ;;  %v1876_v28 = vpop.f32.mrb[7].mxu0 }
  0xf8   : > { %v1761_v29 = vpack.c.bf16 %v663_v26, %v663_v26  ;;  %v1972_v30 = vpop.f32.mrb[7].mxu1 }
  0xf9   : > { %1059 = vst.msk [vmem:[%s2571_s6 + $0xc] sm:$0xf] %vm1055_vm2, %v1729_v27 }
  0xfa   : > { %1091 = vst.msk [vmem:[%s2571_s6 + $0x8c] sm:$0xf] %vm1055_vm2, %v1761_v29  ;;  %v508_v31 = vpop.f32.mrb[8].mxu0 }
  0xfb   : > { %v668_v32 = vpop.f32.mrb[8].mxu1  ;;  %v1730_v33 = vpack.c.bf16 %v508_v31, %v508_v31  ;;  %v1879_v34 = vpop.f32.mrb[9].mxu0 }
  0xfc   : > { %v1762_v35 = vpack.c.bf16 %v668_v32, %v668_v32  ;;  %v1975_v36 = vpop.f32.mrb[9].mxu1 }
  0xfd   : > { %1060 = vst.msk [vmem:[%s2571_s6 + $0x10] sm:$0xf] %vm1055_vm2, %v1730_v33 }
  0xfe   : > { %1092 = vst.msk [vmem:[%s2571_s6 + $0x90] sm:$0xf] %vm1055_vm2, %v1762_v35  ;;  %v513_v37 = vpop.f32.mrb[10].mxu0 }
  0xff   : > { %v673_v38 = vpop.f32.mrb[10].mxu1  ;;  %v1731_v39 = vpack.c.bf16 %v513_v37, %v513_v37  ;;  %v1882_v40 = vpop.f32.mrb[11].mxu0 }
 0x100   : > { %v1763_v41 = vpack.c.bf16 %v673_v38, %v673_v38  ;;  %v1978_v42 = vpop.f32.mrb[11].mxu1 }
 0x101   : > { %1061 = vst.msk [vmem:[%s2571_s6 + $0x14] sm:$0xf] %vm1055_vm2, %v1731_v39 }
 0x102   : > { %1093 = vst.msk [vmem:[%s2571_s6 + $0x94] sm:$0xf] %vm1055_vm2, %v1763_v41  ;;  %v518_v43 = vpop.f32.mrb[12].mxu0 }
 0x103   : > { %v678_v44 = vpop.f32.mrb[12].mxu1  ;;  %v1732_v45 = vpack.c.bf16 %v518_v43, %v518_v43  ;;  %v1885_v46 = vpop.f32.mrb[13].mxu0 }
 0x104   : > { %v1764_v47 = vpack.c.bf16 %v678_v44, %v678_v44  ;;  %v1981_v48 = vpop.f32.mrb[13].mxu1 }
 0x105   : > { %1062 = vst.msk [vmem:[%s2571_s6 + $0x18] sm:$0xf] %vm1055_vm2, %v1732_v45 }
 0x106   : > { %1094 = vst.msk [vmem:[%s2571_s6 + $0x98] sm:$0xf] %vm1055_vm2, %v1764_v47  ;;  %v523_v49 = vpop.f32.mrb[14].mxu0 }
 0x107   : > { %v683_v50 = vpop.f32.mrb[14].mxu1  ;;  %v1733_v51 = vpack.c.bf16 %v523_v49, %v523_v49  ;;  %v1888_v52 = vpop.f32.mrb[15].mxu0 }
 0x108   : > { %v1765_v53 = vpack.c.bf16 %v683_v50, %v683_v50  ;;  %v1984_v54 = vpop.f32.mrb[15].mxu1 }
 0x109   : > { %1063 = vst.msk [vmem:[%s2571_s6 + $0x1c] sm:$0xf] %vm1055_vm2, %v1733_v51 }
 0x10a   : > { %1095 = vst.msk [vmem:[%s2571_s6 + $0x9c] sm:$0xf] %vm1055_vm2, %v1765_v53  ;;  %v528_v55 = vpop.f32.mrb[16].mxu0 }
 0x10b   : > { %v688_v56 = vpop.f32.mrb[16].mxu1  ;;  %v1734_v57 = vpack.c.bf16 %v528_v55, %v528_v55  ;;  %v1891_v58 = vpop.f32.mrb[17].mxu0 }
 0x10c   : > { %v1766_v59 = vpack.c.bf16 %v688_v56, %v688_v56  ;;  %v1987_v60 = vpop.f32.mrb[17].mxu1 }
 0x10d   : > { %1064 = vst.msk [vmem:[%s2571_s6 + $0x20] sm:$0xf] %vm1055_vm2, %v1734_v57 }
 0x10e   : > { %1096 = vst.msk [vmem:[%s2571_s6 + $0xa0] sm:$0xf] %vm1055_vm2, %v1766_v59  ;;  %v533_v61 = vpop.f32.mrb[18].mxu0 }
 0x10f   : > { %v693_v62 = vpop.f32.mrb[18].mxu1  ;;  %v1735_v63 = vpack.c.bf16 %v533_v61, %v533_v61  ;;  %v1894_v0 = vpop.f32.mrb[19].mxu0 }
 0x110   : > { %v1767_v1 = vpack.c.bf16 %v693_v62, %v693_v62  ;;  %v1990_v2 = vpop.f32.mrb[19].mxu1 }
 0x111   : > { %1065 = vst.msk [vmem:[%s2571_s6 + $0x24] sm:$0xf] %vm1055_vm2, %v1735_v63 }
 0x112   : > { %1097 = vst.msk [vmem:[%s2571_s6 + $0xa4] sm:$0xf] %vm1055_vm2, %v1767_v1  ;;  %v538_v3 = vpop.f32.mrb[20].mxu0 }
 0x113   : > { %v698_v4 = vpop.f32.mrb[20].mxu1  ;;  %v1736_v5 = vpack.c.bf16 %v538_v3, %v538_v3  ;;  %v1897_v7 = vpop.f32.mrb[21].mxu0 }
 0x114   : > { %v1768_v8 = vpack.c.bf16 %v698_v4, %v698_v4  ;;  %v1993_v9 = vpop.f32.mrb[21].mxu1 }
 0x115   : > { %1066 = vst.msk [vmem:[%s2571_s6 + $0x28] sm:$0xf] %vm1055_vm2, %v1736_v5 }
 0x116   : > { %1098 = vst.msk [vmem:[%s2571_s6 + $0xa8] sm:$0xf] %vm1055_vm2, %v1768_v8  ;;  %v543_v10 = vpop.f32.mrb[22].mxu0 }
 0x117   : > { %v703_v11 = vpop.f32.mrb[22].mxu1  ;;  %v1737_v12 = vpack.c.bf16 %v543_v10, %v543_v10  ;;  %v1900_v13 = vpop.f32.mrb[23].mxu0 }
 0x118   : > { %v1769_v6 = vpack.c.bf16 %v703_v11, %v703_v11  ;;  %v1996_v14 = vpop.f32.mrb[23].mxu1 }
 0x119   : > { %1067 = vst.msk [vmem:[%s2571_s6 + $0x2c] sm:$0xf] %vm1055_vm2, %v1737_v12 }
 0x11a   : > { %1099 = vst.msk [vmem:[%s2571_s6 + $0xac] sm:$0xf] %vm1055_vm2, %v1769_v6  ;;  %v548_v15 = vpop.f32.mrb[24].mxu0 }
 0x11b   : > { %v708_v16 = vpop.f32.mrb[24].mxu1  ;;  %v1738_v17 = vpack.c.bf16 %v548_v15, %v548_v15  ;;  %v1903_v18 = vpop.f32.mrb[25].mxu0 }
 0x11c   : > { %v1770_v19 = vpack.c.bf16 %v708_v16, %v708_v16  ;;  %v1999_v20 = vpop.f32.mrb[25].mxu1 }
 0x11d   : > { %1068 = vst.msk [vmem:[%s2571_s6 + $0x30] sm:$0xf] %vm1055_vm2, %v1738_v17 }
 0x11e   : > { %1100 = vst.msk [vmem:[%s2571_s6 + $0xb0] sm:$0xf] %vm1055_vm2, %v1770_v19  ;;  %v553_v21 = vpop.f32.mrb[26].mxu0 }
 0x11f   : > { %v713_v22 = vpop.f32.mrb[26].mxu1  ;;  %v1739_v23 = vpack.c.bf16 %v553_v21, %v553_v21  ;;  %v1906_v24 = vpop.f32.mrb[27].mxu0 }
 0x120   : > { %v1771_v25 = vpack.c.bf16 %v713_v22, %v713_v22  ;;  %v2002_v26 = vpop.f32.mrb[27].mxu1 }
 0x121   : > { %1069 = vst.msk [vmem:[%s2571_s6 + $0x34] sm:$0xf] %vm1055_vm2, %v1739_v23 }
 0x122   : > { %1101 = vst.msk [vmem:[%s2571_s6 + $0xb4] sm:$0xf] %vm1055_vm2, %v1771_v25  ;;  %v558_v27 = vpop.f32.mrb[28].mxu0 }
 0x123   : > { %v718_v28 = vpop.f32.mrb[28].mxu1  ;;  %v1740_v29 = vpack.c.bf16 %v558_v27, %v558_v27  ;;  %v1909_v30 = vpop.f32.mrb[29].mxu0 }
 0x124   : > { %v1772_v31 = vpack.c.bf16 %v718_v28, %v718_v28  ;;  %v2005_v32 = vpop.f32.mrb[29].mxu1 }
 0x125   : > { %1070 = vst.msk [vmem:[%s2571_s6 + $0x38] sm:$0xf] %vm1055_vm2, %v1740_v29 }
 0x126   : > { %1102 = vst.msk [vmem:[%s2571_s6 + $0xb8] sm:$0xf] %vm1055_vm2, %v1772_v31  ;;  %v563_v33 = vpop.f32.mrb[30].mxu0 }
 0x127   : > { %v723_v34 = vpop.f32.mrb[30].mxu1  ;;  %v1741_v35 = vpack.c.bf16 %v563_v33, %v563_v33  ;;  %v1912_v36 = vpop.f32.mrb[31].mxu0 }
 0x128   : > { %v1773_v37 = vpack.c.bf16 %v723_v34, %v723_v34  ;;  %v2008_v38 = vpop.f32.mrb[31].mxu1 }
 0x129   : > { %1071 = vst.msk [vmem:[%s2571_s6 + $0x3c] sm:$0xf] %vm1055_vm2, %v1741_v35 }
 0x12a   : > { %1103 = vst.msk [vmem:[%s2571_s6 + $0xbc] sm:$0xf] %vm1055_vm2, %v1773_v37  ;;  %v568_v39 = vpop.f32.mrb[32].mxu0 }
 0x12b   : > { %v728_v40 = vpop.f32.mrb[32].mxu1  ;;  %v1742_v41 = vpack.c.bf16 %v568_v39, %v568_v39  ;;  %v1915_v42 = vpop.f32.mrb[33].mxu0 }
 0x12c   : > { %v1774_v43 = vpack.c.bf16 %v728_v40, %v728_v40  ;;  %v2011_v44 = vpop.f32.mrb[33].mxu1 }
 0x12d   : > { %1072 = vst.msk [vmem:[%s2571_s6 + $0x40] sm:$0xf] %vm1055_vm2, %v1742_v41 }
 0x12e   : > { %1104 = vst.msk [vmem:[%s2571_s6 + $0xc0] sm:$0xf] %vm1055_vm2, %v1774_v43  ;;  %v573_v45 = vpop.f32.mrb[34].mxu0 }
 0x12f   : > { %v733_v46 = vpop.f32.mrb[34].mxu1  ;;  %v1743_v47 = vpack.c.bf16 %v573_v45, %v573_v45  ;;  %v1918_v48 = vpop.f32.mrb[35].mxu0 }
 0x130   : > { %v1775_v49 = vpack.c.bf16 %v733_v46, %v733_v46  ;;  %v2014_v50 = vpop.f32.mrb[35].mxu1 }
 0x131   : > { %1073 = vst.msk [vmem:[%s2571_s6 + $0x44] sm:$0xf] %vm1055_vm2, %v1743_v47 }
 0x132   : > { %1105 = vst.msk [vmem:[%s2571_s6 + $0xc4] sm:$0xf] %vm1055_vm2, %v1775_v49  ;;  %v578_v51 = vpop.f32.mrb[36].mxu0 }
 0x133   : > { %v738_v52 = vpop.f32.mrb[36].mxu1  ;;  %v1744_v53 = vpack.c.bf16 %v578_v51, %v578_v51  ;;  %v1921_v54 = vpop.f32.mrb[37].mxu0 }
 0x134   : > { %v1776_v55 = vpack.c.bf16 %v738_v52, %v738_v52  ;;  %v2017_v56 = vpop.f32.mrb[37].mxu1 }
 0x135   : > { %1074 = vst.msk [vmem:[%s2571_s6 + $0x48] sm:$0xf] %vm1055_vm2, %v1744_v53 }
 0x136   : > { %1106 = vst.msk [vmem:[%s2571_s6 + $0xc8] sm:$0xf] %vm1055_vm2, %v1776_v55  ;;  %v583_v57 = vpop.f32.mrb[38].mxu0 }
 0x137   : > { %v743_v58 = vpop.f32.mrb[38].mxu1  ;;  %v1745_v59 = vpack.c.bf16 %v583_v57, %v583_v57  ;;  %v1924_v60 = vpop.f32.mrb[39].mxu0 }
 0x138   : > { %v1777_v61 = vpack.c.bf16 %v743_v58, %v743_v58  ;;  %v2020_v62 = vpop.f32.mrb[39].mxu1 }
 0x139   : > { %1075 = vst.msk [vmem:[%s2571_s6 + $0x4c] sm:$0xf] %vm1055_vm2, %v1745_v59 }
 0x13a   : > { %1107 = vst.msk [vmem:[%s2571_s6 + $0xcc] sm:$0xf] %vm1055_vm2, %v1777_v61  ;;  %v588_v63 = vpop.f32.mrb[40].mxu0 }
 0x13b   : > { %v748_v0 = vpop.f32.mrb[40].mxu1  ;;  %v1746_v1 = vpack.c.bf16 %v588_v63, %v588_v63  ;;  %v1927_v2 = vpop.f32.mrb[41].mxu0 }
 0x13c   : > { %v1778_v3 = vpack.c.bf16 %v748_v0, %v748_v0  ;;  %v2023_v4 = vpop.f32.mrb[41].mxu1 }
 0x13d   : > { %1076 = vst.msk [vmem:[%s2571_s6 + $0x50] sm:$0xf] %vm1055_vm2, %v1746_v1 }
 0x13e   : > { %1108 = vst.msk [vmem:[%s2571_s6 + $0xd0] sm:$0xf] %vm1055_vm2, %v1778_v3  ;;  %v593_v5 = vpop.f32.mrb[42].mxu0 }
 0x13f   : > { %v753_v7 = vpop.f32.mrb[42].mxu1  ;;  %v1747_v8 = vpack.c.bf16 %v593_v5, %v593_v5  ;;  %v1930_v9 = vpop.f32.mrb[43].mxu0 }
 0x140   : > { %v1779_v10 = vpack.c.bf16 %v753_v7, %v753_v7  ;;  %v2026_v11 = vpop.f32.mrb[43].mxu1 }
 0x141   : > { %1077 = vst.msk [vmem:[%s2571_s6 + $0x54] sm:$0xf] %vm1055_vm2, %v1747_v8 }
 0x142   : > { %1109 = vst.msk [vmem:[%s2571_s6 + $0xd4] sm:$0xf] %vm1055_vm2, %v1779_v10  ;;  %v598_v12 = vpop.f32.mrb[44].mxu0 }
 0x143   : > { %v758_v13 = vpop.f32.mrb[44].mxu1  ;;  %v1748_v6 = vpack.c.bf16 %v598_v12, %v598_v12  ;;  %v1933_v14 = vpop.f32.mrb[45].mxu0 }
 0x144   : > { %v1780_v15 = vpack.c.bf16 %v758_v13, %v758_v13  ;;  %v2029_v16 = vpop.f32.mrb[45].mxu1 }
 0x145   : > { %1078 = vst.msk [vmem:[%s2571_s6 + $0x58] sm:$0xf] %vm1055_vm2, %v1748_v6 }
 0x146   : > { %1110 = vst.msk [vmem:[%s2571_s6 + $0xd8] sm:$0xf] %vm1055_vm2, %v1780_v15  ;;  %v603_v17 = vpop.f32.mrb[46].mxu0 }
 0x147   : > { %v763_v18 = vpop.f32.mrb[46].mxu1  ;;  %v1749_v19 = vpack.c.bf16 %v603_v17, %v603_v17  ;;  %v1936_v20 = vpop.f32.mrb[47].mxu0 }
 0x148   : > { %v1781_v21 = vpack.c.bf16 %v763_v18, %v763_v18  ;;  %v2032_v22 = vpop.f32.mrb[47].mxu1 }
 0x149   : > { %1079 = vst.msk [vmem:[%s2571_s6 + $0x5c] sm:$0xf] %vm1055_vm2, %v1749_v19 }
 0x14a   : > { %1111 = vst.msk [vmem:[%s2571_s6 + $0xdc] sm:$0xf] %vm1055_vm2, %v1781_v21  ;;  %v608_v23 = vpop.f32.mrb[48].mxu0 }
 0x14b   : > { %v768_v24 = vpop.f32.mrb[48].mxu1  ;;  %v1750_v25 = vpack.c.bf16 %v608_v23, %v608_v23  ;;  %v1939_v26 = vpop.f32.mrb[49].mxu0 }
 0x14c   : > { %v1782_v27 = vpack.c.bf16 %v768_v24, %v768_v24  ;;  %v2035_v28 = vpop.f32.mrb[49].mxu1 }
 0x14d   : > { %1080 = vst.msk [vmem:[%s2571_s6 + $0x60] sm:$0xf] %vm1055_vm2, %v1750_v25 }
 0x14e   : > { %1112 = vst.msk [vmem:[%s2571_s6 + $0xe0] sm:$0xf] %vm1055_vm2, %v1782_v27  ;;  %v613_v29 = vpop.f32.mrb[50].mxu0 }
 0x14f   : > { %v773_v30 = vpop.f32.mrb[50].mxu1  ;;  %v1751_v31 = vpack.c.bf16 %v613_v29, %v613_v29  ;;  %v1942_v32 = vpop.f32.mrb[51].mxu0 }
 0x150   : > { %v1783_v33 = vpack.c.bf16 %v773_v30, %v773_v30  ;;  %v2038_v34 = vpop.f32.mrb[51].mxu1 }
 0x151   : > { %1081 = vst.msk [vmem:[%s2571_s6 + $0x64] sm:$0xf] %vm1055_vm2, %v1751_v31 }
 0x152   : > { %1113 = vst.msk [vmem:[%s2571_s6 + $0xe4] sm:$0xf] %vm1055_vm2, %v1783_v33  ;;  %v618_v35 = vpop.f32.mrb[52].mxu0 }
 0x153   : > { %v778_v36 = vpop.f32.mrb[52].mxu1  ;;  %v1752_v37 = vpack.c.bf16 %v618_v35, %v618_v35  ;;  %v1945_v38 = vpop.f32.mrb[53].mxu0 }
 0x154   : > { %v1784_v39 = vpack.c.bf16 %v778_v36, %v778_v36  ;;  %v2041_v40 = vpop.f32.mrb[53].mxu1 }
 0x155   : > { %1082 = vst.msk [vmem:[%s2571_s6 + $0x68] sm:$0xf] %vm1055_vm2, %v1752_v37 }
 0x156   : > { %1114 = vst.msk [vmem:[%s2571_s6 + $0xe8] sm:$0xf] %vm1055_vm2, %v1784_v39  ;;  %v623_v41 = vpop.f32.mrb[54].mxu0 }
 0x157   : > { %v783_v42 = vpop.f32.mrb[54].mxu1  ;;  %v1753_v43 = vpack.c.bf16 %v623_v41, %v623_v41  ;;  %v1948_v44 = vpop.f32.mrb[55].mxu0 }
 0x158   : > { %v1785_v45 = vpack.c.bf16 %v783_v42, %v783_v42  ;;  %v2044_v46 = vpop.f32.mrb[55].mxu1 }
 0x159   : > { %1083 = vst.msk [vmem:[%s2571_s6 + $0x6c] sm:$0xf] %vm1055_vm2, %v1753_v43 }
 0x15a   : > { %1115 = vst.msk [vmem:[%s2571_s6 + $0xec] sm:$0xf] %vm1055_vm2, %v1785_v45  ;;  %v628_v47 = vpop.f32.mrb[56].mxu0 }
 0x15b   : > { %v788_v48 = vpop.f32.mrb[56].mxu1  ;;  %v1754_v49 = vpack.c.bf16 %v628_v47, %v628_v47  ;;  %v1951_v50 = vpop.f32.mrb[57].mxu0 }
 0x15c   : > { %v1786_v51 = vpack.c.bf16 %v788_v48, %v788_v48  ;;  %v2047_v52 = vpop.f32.mrb[57].mxu1 }
 0x15d   : > { %1084 = vst.msk [vmem:[%s2571_s6 + $0x70] sm:$0xf] %vm1055_vm2, %v1754_v49 }
 0x15e   : > { %1116 = vst.msk [vmem:[%s2571_s6 + $0xf0] sm:$0xf] %vm1055_vm2, %v1786_v51  ;;  %v633_v53 = vpop.f32.mrb[58].mxu0 }
 0x15f   : > { %v793_v54 = vpop.f32.mrb[58].mxu1  ;;  %v1755_v55 = vpack.c.bf16 %v633_v53, %v633_v53  ;;  %v1954_v56 = vpop.f32.mrb[59].mxu0 }
 0x160   : > { %v1787_v57 = vpack.c.bf16 %v793_v54, %v793_v54  ;;  %v2050_v58 = vpop.f32.mrb[59].mxu1 }
 0x161   : > { %1085 = vst.msk [vmem:[%s2571_s6 + $0x74] sm:$0xf] %vm1055_vm2, %v1755_v55 }
 0x162   : > { %1117 = vst.msk [vmem:[%s2571_s6 + $0xf4] sm:$0xf] %vm1055_vm2, %v1787_v57  ;;  %v638_v59 = vpop.f32.mrb[60].mxu0 }
 0x163   : > { %v798_v60 = vpop.f32.mrb[60].mxu1  ;;  %v1756_v61 = vpack.c.bf16 %v638_v59, %v638_v59  ;;  %v1957_v62 = vpop.f32.mrb[61].mxu0  ;;  %1125 = sbr.rel (!%p2292_p4) target bundleno = 465 (0x1d1), region = 32 }
 0x164   : > { %v1788_v63 = vpack.c.bf16 %v798_v60, %v798_v60  ;;  %v2053_v0 = vpop.f32.mrb[61].mxu1 }
 0x165   : > { %1086 = vst.msk [vmem:[%s2571_s6 + $0x78] sm:$0xf] %vm1055_vm2, %v1756_v61 }
 0x166   : > { %1118 = vst.msk [vmem:[%s2571_s6 + $0xf8] sm:$0xf] %vm1055_vm2, %v1788_v63  ;;  %v643_v1 = vpop.f32.mrb[62].mxu0 }
 0x167   : > { %v1757_v2 = vpack.c.bf16 %v643_v1, %v643_v1  ;;  %v1960_v3 = vpop.f32.mrb[63].mxu0 }
 0x169   : > { %1087 = vst.msk [vmem:[%s2571_s6 + $0x7c] sm:$0xf] %vm1055_vm2, %v1757_v2 }
 0x16a   : > { %s2902_s7 = smov (!%p1128_p8, %s1127_s7), 63 }
 0x16b   : > { %s1714_s15 = sshll.u32 %s2902_s7, 6 }
 0x16c   : > { %p1717_p9 = scmp.eq.s32.totalorder %s1714_s15, 0 }
 0x16d   : > { %2157 = sdivrem.u32 (!%p1717_p9), %s2902_s7, 63 }
 0x16e   : > { %1136 = sbr.rel (%p1717_p9) target bundleno = 465 (0x1d1), region = 36 }
 0x176   : > { %s2712_s17 = spop.drf %2157 }
 0x177   : > { %p1718_p10 = scmp.le.s32.totalorder %s2712_s17, 0 }
 0x178   : > { %s2895_s12 = smov (!%p1718_p10), %s2706_s14  ;;  %s2896_s18 = smov (!%p1718_p10), %s2571_s6 }
 0x179   : > { %1539 = sbr.rel (%p1718_p10) target bundleno = 436 (0x1b4), region = 108  ;;  %s2721_s19 = smov (!%p1718_p10), 0  }
 0x17a   : > { %s2723_s20 = smov (!%p1718_p10), 0  }
 0x180 LB: >> { %v1153_v4 = vld [vmem:[%s2223_s18] sm:$0xf]  ;;  %v1155_v5 = vld [vmem:[%s2223_s18 + $0x4] sm:$0xf]  ;;  %v1157_v7 = vld [vmem:[%s2223_s18 + $0x8] sm:$0xf]  ;;  %s2231_s20 = sphi %s2723_s20, %s1147_s20   ;;  %s2227_s19 = sphi %s2721_s19, %s2897_s19   ;;  %s2223_s18 = sphi %s2896_s18, %s1284_s18   ;;  %s2219_s12 = sphi %s2895_s12, %s1285_s12  }
 0x181   : >> { %1154 = vst [vmem:[%s2219_s12] sm:$0xf] %v1153_v4  ;;  %1156 = vst [vmem:[%s2219_s12 + $0x4] sm:$0xf] %v1155_v5  ;;  %v1159_v8 = vld [vmem:[%s2223_s18 + $0xc] sm:$0xf]  ;;  %s1279_s21 = sadd.s32 1, %s2227_s19 }
 0x182   : >> { %1158 = vst [vmem:[%s2219_s12 + $0x8] sm:$0xf] %v1157_v7  ;;  %v1161_v9 = vld [vmem:[%s2223_s18 + $0x10] sm:$0xf]  ;;  %v1163_v10 = vld [vmem:[%s2223_s18 + $0x14] sm:$0xf]  ;;  %p1280_p11 = scmp.ge.s32.totalorder %s1279_s21, %s2712_s17 }
 0x183   : >> { %1160 = vst [vmem:[%s2219_s12 + $0xc] sm:$0xf] %v1159_v8  ;;  %1162 = vst [vmem:[%s2219_s12 + $0x10] sm:$0xf] %v1161_v9  ;;  %v1165_v11 = vld [vmem:[%s2223_s18 + $0x18] sm:$0xf] }
 0x184   : >> { %1164 = vst [vmem:[%s2219_s12 + $0x14] sm:$0xf] %v1163_v10  ;;  %v1167_v12 = vld [vmem:[%s2223_s18 + $0x1c] sm:$0xf]  ;;  %v1169_v13 = vld [vmem:[%s2223_s18 + $0x20] sm:$0xf] }
 0x185   : >> { %1166 = vst [vmem:[%s2219_s12 + $0x18] sm:$0xf] %v1165_v11  ;;  %1168 = vst [vmem:[%s2219_s12 + $0x1c] sm:$0xf] %v1167_v12  ;;  %v1171_v6 = vld [vmem:[%s2223_s18 + $0x24] sm:$0xf] }
 0x186   : >> { %1170 = vst [vmem:[%s2219_s12 + $0x20] sm:$0xf] %v1169_v13  ;;  %v1173_v14 = vld [vmem:[%s2223_s18 + $0x28] sm:$0xf]  ;;  %v1175_v15 = vld [vmem:[%s2223_s18 + $0x2c] sm:$0xf] }
 0x187   : >> { %1172 = vst [vmem:[%s2219_s12 + $0x24] sm:$0xf] %v1171_v6  ;;  %1174 = vst [vmem:[%s2219_s12 + $0x28] sm:$0xf] %v1173_v14  ;;  %v1177_v16 = vld [vmem:[%s2223_s18 + $0x30] sm:$0xf] }
 0x188   : >> { %1176 = vst [vmem:[%s2219_s12 + $0x2c] sm:$0xf] %v1175_v15  ;;  %v1179_v17 = vld [vmem:[%s2223_s18 + $0x34] sm:$0xf]  ;;  %v1181_v18 = vld [vmem:[%s2223_s18 + $0x38] sm:$0xf] }
 0x189   : >> { %1178 = vst [vmem:[%s2219_s12 + $0x30] sm:$0xf] %v1177_v16  ;;  %1180 = vst [vmem:[%s2219_s12 + $0x34] sm:$0xf] %v1179_v17  ;;  %v1183_v19 = vld [vmem:[%s2223_s18 + $0x3c] sm:$0xf] }
 0x18a   : >> { %1182 = vst [vmem:[%s2219_s12 + $0x38] sm:$0xf] %v1181_v18  ;;  %v1185_v20 = vld [vmem:[%s2223_s18 + $0x40] sm:$0xf]  ;;  %v1187_v21 = vld [vmem:[%s2223_s18 + $0x44] sm:$0xf] }
 0x18b   : >> { %1184 = vst [vmem:[%s2219_s12 + $0x3c] sm:$0xf] %v1183_v19  ;;  %1186 = vst [vmem:[%s2219_s12 + $0x40] sm:$0xf] %v1185_v20  ;;  %v1189_v22 = vld [vmem:[%s2223_s18 + $0x48] sm:$0xf] }
 0x18c   : >> { %1188 = vst [vmem:[%s2219_s12 + $0x44] sm:$0xf] %v1187_v21  ;;  %v1191_v23 = vld [vmem:[%s2223_s18 + $0x4c] sm:$0xf]  ;;  %v1193_v24 = vld [vmem:[%s2223_s18 + $0x50] sm:$0xf] }
 0x18d   : >> { %1190 = vst [vmem:[%s2219_s12 + $0x48] sm:$0xf] %v1189_v22  ;;  %1192 = vst [vmem:[%s2219_s12 + $0x4c] sm:$0xf] %v1191_v23  ;;  %v1195_v25 = vld [vmem:[%s2223_s18 + $0x54] sm:$0xf] }
 0x18e   : >> { %1194 = vst [vmem:[%s2219_s12 + $0x50] sm:$0xf] %v1193_v24  ;;  %v1197_v26 = vld [vmem:[%s2223_s18 + $0x58] sm:$0xf]  ;;  %v1199_v27 = vld [vmem:[%s2223_s18 + $0x5c] sm:$0xf] }
 0x18f   : >> { %1196 = vst [vmem:[%s2219_s12 + $0x54] sm:$0xf] %v1195_v25  ;;  %1198 = vst [vmem:[%s2219_s12 + $0x58] sm:$0xf] %v1197_v26  ;;  %v1201_v28 = vld [vmem:[%s2223_s18 + $0x60] sm:$0xf] }
 0x190   : >> { %1200 = vst [vmem:[%s2219_s12 + $0x5c] sm:$0xf] %v1199_v27  ;;  %v1203_v29 = vld [vmem:[%s2223_s18 + $0x64] sm:$0xf]  ;;  %v1205_v30 = vld [vmem:[%s2223_s18 + $0x68] sm:$0xf] }
 0x191   : >> { %1202 = vst [vmem:[%s2219_s12 + $0x60] sm:$0xf] %v1201_v28  ;;  %1204 = vst [vmem:[%s2219_s12 + $0x64] sm:$0xf] %v1203_v29  ;;  %v1207_v31 = vld [vmem:[%s2223_s18 + $0x6c] sm:$0xf] }
 0x192   : >> { %1206 = vst [vmem:[%s2219_s12 + $0x68] sm:$0xf] %v1205_v30  ;;  %v1209_v32 = vld [vmem:[%s2223_s18 + $0x70] sm:$0xf]  ;;  %v1211_v33 = vld [vmem:[%s2223_s18 + $0x74] sm:$0xf] }
 0x193   : >> { %1208 = vst [vmem:[%s2219_s12 + $0x6c] sm:$0xf] %v1207_v31  ;;  %1210 = vst [vmem:[%s2219_s12 + $0x70] sm:$0xf] %v1209_v32  ;;  %v1213_v34 = vld [vmem:[%s2223_s18 + $0x78] sm:$0xf] }
 0x194   : >> { %1212 = vst [vmem:[%s2219_s12 + $0x74] sm:$0xf] %v1211_v33  ;;  %v1215_v35 = vld [vmem:[%s2223_s18 + $0x7c] sm:$0xf]  ;;  %v1217_v36 = vld [vmem:[%s2223_s18 + $0x80] sm:$0xf] }
 0x195   : >> { %1214 = vst [vmem:[%s2219_s12 + $0x78] sm:$0xf] %v1213_v34  ;;  %1216 = vst [vmem:[%s2219_s12 + $0x7c] sm:$0xf] %v1215_v35  ;;  %v1219_v37 = vld [vmem:[%s2223_s18 + $0x84] sm:$0xf] }
 0x196   : >> { %1218 = vst [vmem:[%s2219_s12 + $0x80] sm:$0xf] %v1217_v36  ;;  %v1221_v38 = vld [vmem:[%s2223_s18 + $0x88] sm:$0xf]  ;;  %v1223_v39 = vld [vmem:[%s2223_s18 + $0x8c] sm:$0xf] }
 0x197   : >> { %1220 = vst [vmem:[%s2219_s12 + $0x84] sm:$0xf] %v1219_v37  ;;  %1222 = vst [vmem:[%s2219_s12 + $0x88] sm:$0xf] %v1221_v38  ;;  %v1225_v40 = vld [vmem:[%s2223_s18 + $0x90] sm:$0xf] }
 0x198   : >> { %1224 = vst [vmem:[%s2219_s12 + $0x8c] sm:$0xf] %v1223_v39  ;;  %v1227_v41 = vld [vmem:[%s2223_s18 + $0x94] sm:$0xf]  ;;  %v1229_v42 = vld [vmem:[%s2223_s18 + $0x98] sm:$0xf] }
 0x199   : >> { %1226 = vst [vmem:[%s2219_s12 + $0x90] sm:$0xf] %v1225_v40  ;;  %1228 = vst [vmem:[%s2219_s12 + $0x94] sm:$0xf] %v1227_v41  ;;  %v1231_v43 = vld [vmem:[%s2223_s18 + $0x9c] sm:$0xf] }
 0x19a   : >> { %1230 = vst [vmem:[%s2219_s12 + $0x98] sm:$0xf] %v1229_v42  ;;  %v1233_v44 = vld [vmem:[%s2223_s18 + $0xa0] sm:$0xf]  ;;  %v1235_v45 = vld [vmem:[%s2223_s18 + $0xa4] sm:$0xf] }
 0x19b   : >> { %1232 = vst [vmem:[%s2219_s12 + $0x9c] sm:$0xf] %v1231_v43  ;;  %1234 = vst [vmem:[%s2219_s12 + $0xa0] sm:$0xf] %v1233_v44  ;;  %v1237_v46 = vld [vmem:[%s2223_s18 + $0xa8] sm:$0xf] }
 0x19c   : >> { %1236 = vst [vmem:[%s2219_s12 + $0xa4] sm:$0xf] %v1235_v45  ;;  %v1239_v47 = vld [vmem:[%s2223_s18 + $0xac] sm:$0xf]  ;;  %v1241_v48 = vld [vmem:[%s2223_s18 + $0xb0] sm:$0xf] }
 0x19d   : >> { %1238 = vst [vmem:[%s2219_s12 + $0xa8] sm:$0xf] %v1237_v46  ;;  %1240 = vst [vmem:[%s2219_s12 + $0xac] sm:$0xf] %v1239_v47  ;;  %v1243_v49 = vld [vmem:[%s2223_s18 + $0xb4] sm:$0xf] }
 0x19e   : >> { %1242 = vst [vmem:[%s2219_s12 + $0xb0] sm:$0xf] %v1241_v48  ;;  %v1245_v50 = vld [vmem:[%s2223_s18 + $0xb8] sm:$0xf]  ;;  %v1247_v51 = vld [vmem:[%s2223_s18 + $0xbc] sm:$0xf] }
 0x19f   : >> { %1244 = vst [vmem:[%s2219_s12 + $0xb4] sm:$0xf] %v1243_v49  ;;  %1246 = vst [vmem:[%s2219_s12 + $0xb8] sm:$0xf] %v1245_v50  ;;  %v1249_v52 = vld [vmem:[%s2223_s18 + $0xc0] sm:$0xf] }
 0x1a0   : >> { %1248 = vst [vmem:[%s2219_s12 + $0xbc] sm:$0xf] %v1247_v51  ;;  %v1251_v53 = vld [vmem:[%s2223_s18 + $0xc4] sm:$0xf]  ;;  %v1253_v54 = vld [vmem:[%s2223_s18 + $0xc8] sm:$0xf] }
 0x1a1   : >> { %1250 = vst [vmem:[%s2219_s12 + $0xc0] sm:$0xf] %v1249_v52  ;;  %1252 = vst [vmem:[%s2219_s12 + $0xc4] sm:$0xf] %v1251_v53  ;;  %v1255_v55 = vld [vmem:[%s2223_s18 + $0xcc] sm:$0xf] }
 0x1a2   : >> { %1254 = vst [vmem:[%s2219_s12 + $0xc8] sm:$0xf] %v1253_v54  ;;  %v1257_v56 = vld [vmem:[%s2223_s18 + $0xd0] sm:$0xf]  ;;  %v1259_v57 = vld [vmem:[%s2223_s18 + $0xd4] sm:$0xf] }
 0x1a3   : >> { %1256 = vst [vmem:[%s2219_s12 + $0xcc] sm:$0xf] %v1255_v55  ;;  %1258 = vst [vmem:[%s2219_s12 + $0xd0] sm:$0xf] %v1257_v56  ;;  %v1261_v58 = vld [vmem:[%s2223_s18 + $0xd8] sm:$0xf] }
 0x1a4   : >> { %1260 = vst [vmem:[%s2219_s12 + $0xd4] sm:$0xf] %v1259_v57  ;;  %v1263_v59 = vld [vmem:[%s2223_s18 + $0xdc] sm:$0xf]  ;;  %v1265_v60 = vld [vmem:[%s2223_s18 + $0xe0] sm:$0xf] }
 0x1a5   : >> { %1262 = vst [vmem:[%s2219_s12 + $0xd8] sm:$0xf] %v1261_v58  ;;  %1264 = vst [vmem:[%s2219_s12 + $0xdc] sm:$0xf] %v1263_v59  ;;  %v1267_v61 = vld [vmem:[%s2223_s18 + $0xe4] sm:$0xf] }
 0x1a6   : >> { %1266 = vst [vmem:[%s2219_s12 + $0xe0] sm:$0xf] %v1265_v60  ;;  %v1269_v62 = vld [vmem:[%s2223_s18 + $0xe8] sm:$0xf]  ;;  %v1271_v63 = vld [vmem:[%s2223_s18 + $0xec] sm:$0xf] }
 0x1a7   : >> { %1268 = vst [vmem:[%s2219_s12 + $0xe4] sm:$0xf] %v1267_v61  ;;  %1270 = vst [vmem:[%s2219_s12 + $0xe8] sm:$0xf] %v1269_v62  ;;  %v1273_v0 = vld [vmem:[%s2223_s18 + $0xf0] sm:$0xf] }
 0x1a8   : >> { %1272 = vst [vmem:[%s2219_s12 + $0xec] sm:$0xf] %v1271_v63  ;;  %v1275_v1 = vld [vmem:[%s2223_s18 + $0xf4] sm:$0xf]  ;;  %v1277_v2 = vld [vmem:[%s2223_s18 + $0xf8] sm:$0xf] }
 0x1a9   : >> { %1274 = vst [vmem:[%s2219_s12 + $0xf0] sm:$0xf] %v1273_v0  ;;  %1276 = vst [vmem:[%s2219_s12 + $0xf4] sm:$0xf] %v1275_v1  ;;  %s2904_s21 = smov (%p1280_p11, %s1279_s21), 0  ;;  %s1147_s20 = sadd.s32 1, %s2231_s20  }
 0x1aa   : >> { %1278 = vst [vmem:[%s2219_s12 + $0xf8] sm:$0xf] %v1277_v2  ;;  %s1282_s22 = smul.u32 252, %s2904_s21  ;;  %p1146_p12 = scmp.ge.s32.totalorder %s1147_s20, %s2712_s17 }
 0x1ab   : >> { %s2897_s19 = smov %s2904_s21 }
 0x1ac   : >> { %s1284_s18 = scalar_lea.vmem %s2571_s6, %s1282_s22 [#allocation2]   ;;  %s1285_s12 = scalar_lea.vmem %s2706_s14, %s1282_s22  }
 0x1ad   : > { %1149 = sbr.rel (!%p1146_p12) target bundleno = 384 (0x180), region = 114 }
 0x1b4 PF: > { %2159 = sdivrem.u32 %s2902_s7, 63 }
 0x1b5   : > { %s1719_s23 = smul.u32 252, %s2712_s17 }
 0x1b7   : > { %s1290_s24 = scalar_lea.vmem %s2571_s6, %s1719_s23 [#allocation2]   ;;  %s1292_s25 = scalar_lea.vmem %s2706_s14, %s1719_s23  }
 0x1bd   : > { %s2160_s26 = spop.drf %2159 }
 0x1be   : > { %p1721_p13 = scmp.le.s32.totalorder %s2160_s26, 0 }
 0x1bf   : > { %s2233_s27 = smov (!%p1721_p13), %s1292_s25   ;;  %s2237_s28 = smov (!%p1721_p13), %s1290_s24  }
 0x1c0   : > { %1553 = sbr.rel (%p1721_p13) target bundleno = 465 (0x1d1), region = 119  ;;  %s2241_s29 = smov (!%p1721_p13), 0  }
 0x1c1   : > { %s2245_s30 = smov (!%p1721_p13), 0  }
 0x1c7 LB: >> { %v1302_v3 = vld [vmem:[%s2239_s28] sm:$0xf]  ;;  %s1304_s3 = sadd.s32 1, %s2243_s29  ;;  %s1296_s30 = sadd.s32 1, %s2247_s30   ;;  %s2247_s30 = sphi %s2245_s30, %s1296_s30   ;;  %s2243_s29 = sphi %s2241_s29, %s2242_s29   ;;  %s2239_s28 = sphi %s2237_s28, %s1309_s28   ;;  %s2235_s27 = sphi %s2233_s27, %s1310_s27  }
 0x1c8   : >> { %1303 = vst [vmem:[%s2235_s27] sm:$0xf] %v1302_v3  ;;  %p1305_p0 = scmp.ge.s32.totalorder %s1304_s3, %s2160_s26  ;;  %p1295_p1 = scmp.ge.s32.totalorder %s1296_s30, %s2160_s26 }
 0x1ca   : >> { %s2906_s3 = smov (%p1305_p0, %s1304_s3), 0  ;;  %1298 = sbr.rel (!%p1295_p1) target bundleno = 455 (0x1c7), region = 125 }
 0x1cb   : >> { %s1722_s4 = sshll.u32 %s2906_s3, 2  ;;  %s2242_s29 = smov %s2906_s3  }
 0x1cc   : >> { %s1309_s28 = scalar_lea.vmem %s1290_s24, %s1722_s4 [#allocation2]   ;;  %s1310_s27 = scalar_lea.vmem %s1292_s25, %s1722_s4  }
 0x1d1 PF: > { %p9_p2 = scmp.ge.s32.totalorder %s2282_s13, 4   ;;  %s2898_s9 = smov %s2211_s10 }
 0x1d2   : > { %s2899_s10 = smov %s2290_s16  ;;  %s2900_s11 = smov %s2282_s13 }
 0x1d3   :  { %11 = sbr.rel (!%p9_p2) target bundleno = 2 (0x2), region = 136 }

</bundles_post_ra>
